<compile_context>
chip_gen: v7x
topology: tpu7x:2x2x1
jax: 0.10.0
libtpu: 0.0.40
codegen_flags: <defaults>
</compile_context>

<pallas_src>
import functools

import jax
import jax.numpy as jnp
from jax.experimental import pallas as pl
from jax.experimental.pallas import tpu as pltpu

_BN_EPS = 1e-5
_EXPANSION = 4
_LANES = 128


# ----------------------------- small helpers -------------------------------------------

def _round_up(n, m):
    return ((n + m - 1) // m) * m


def _pad_last(x, target):
    pad = target - x.shape[-1]
    if pad == 0:
        return x
    cfg = [(0, 0)] * (x.ndim - 1) + [(0, pad)]
    return jnp.pad(x, cfg)


def _pick_tn(cout_pad):
    # 256-wide tiles match the v6e/v7x MXU; 128 otherwise (and always valid on v5e).
    return 256 if cout_pad % 256 == 0 else 128


def _cparams():
    return pltpu.CompilerParams(dimension_semantics=("parallel",))


# ----------------------------- Pallas kernels ------------------------------------------

def _bn_fold(acc, gamma, beta):
    """Training-mode BN folded to per-channel (scale, bias). acc: (M, tn) f32."""
    inv_m = 1.0 / acc.shape[0]
    mean = jnp.sum(acc, axis=0, keepdims=True) * inv_m
    ex2 = jnp.sum(acc * acc, axis=0, keepdims=True) * inv_m
    var = jnp.maximum(ex2 - mean * mean, 0.0)          # one-pass, clamp for safety
    scale = gamma * jax.lax.rsqrt(var + _BN_EPS)
    bias = beta - mean * scale
    return scale, bias


def _conv1x1_bn_kernel(x_ref, w_ref, g_ref, b_ref, o_ref, *, apply_relu):
    """(M, Cin) @ (Cin, tn) + training-mode BN + optional ReLU, one Cout tile per step."""
    acc = jnp.dot(x_ref[...], w_ref[...], preferred_element_type=jnp.float32)
    scale, bias = _bn_fold(acc, g_ref[...], b_ref[...])
    y = acc * scale + bias
    if apply_relu:
        y = jnp.maximum(y, 0.0)
    o_ref[...] = y.astype(o_ref.dtype)


def _conv3x3_bn_kernel(x_ref, w_ref, g_ref, b_ref, o_ref):
    """3x3 / stride-1 conv + BN + ReLU.

    x_ref: (N, H+2, W+2, Cin_p) padded activation (same block every grid step)
    w_ref: (9, Cin_p, tn)       tap weights for this Cout tile
    o_ref: (N*H*W, tn)
    """
    n, hp, wp, cin = x_ref.shape
    h, w = hp - 2, wp - 2
    m = n * h * w
    tn = w_ref.shape[2]
    acc = jnp.zeros((m, tn), jnp.float32)
    for dy in range(3):                                  # static unroll: 9 MXU matmuls
        for dx in range(3):
            tap = x_ref[:, dy:dy + h, dx:dx + w, :].reshape(m, cin)
            acc = acc + jnp.dot(tap, w_ref[dy * 3 + dx],
                                preferred_element_type=jnp.float32)
    scale, bias = _bn_fold(acc, g_ref[...], b_ref[...])
    o_ref[...] = jnp.maximum(acc * scale + bias, 0.0).astype(o_ref.dtype)


def _conv1x1_bn_add_relu_kernel(x_ref, w_ref, g_ref, b_ref, sc_ref, out_ref, pre_ref):
    """conv3 (1x1) + bn3 + residual add + ReLU, emitting both preact and out."""
    acc = jnp.dot(x_ref[...], w_ref[...], preferred_element_type=jnp.float32)
    scale, bias = _bn_fold(acc, g_ref[...], b_ref[...])
    y = acc * scale + bias + sc_ref[...].astype(jnp.float32)
    pre_ref[...] = y.astype(pre_ref.dtype)
    out_ref[...] = jnp.maximum(y, 0.0).astype(out_ref.dtype)


# ----------------------------- pallas_call wrappers -------------------------------------

def _conv1x1_bn(x, w, g, b, *, apply_relu, out_dtype):
    m, cin = x.shape
    cout = w.shape[1]
    tn = _pick_tn(cout)
    return pl.pallas_call(
        functools.partial(_conv1x1_bn_kernel, apply_relu=apply_relu),
        out_shape=jax.ShapeDtypeStruct((m, cout), out_dtype),
        grid=(cout // tn,),
        in_specs=[
            pl.BlockSpec((m, cin), lambda j: (0, 0)),      # full activation, resident
            pl.BlockSpec((cin, tn), lambda j: (0, j)),     # weight slab per Cout tile
            pl.BlockSpec((1, tn), lambda j: (0, j)),       # gamma
            pl.BlockSpec((1, tn), lambda j: (0, j)),       # beta
        ],
        out_specs=pl.BlockSpec((m, tn), lambda j: (0, j)),
        compiler_params=_cparams(),
    )(x, w, g, b)


def _conv3x3_bn(xpad_nhwc, w_taps, g, b, out_dtype):
    n, hp, wp, cin = xpad_nhwc.shape
    h, w_ = hp - 2, wp - 2
    m = n * h * w_
    cout = w_taps.shape[2]
    tn = _pick_tn(cout)
    return pl.pallas_call(
        _conv3x3_bn_kernel,
        out_shape=jax.ShapeDtypeStruct((m, cout), out_dtype),
        grid=(cout // tn,),
        in_specs=[
            pl.BlockSpec((n, hp, wp, cin), lambda j: (0, 0, 0, 0)),  # halo'd activation
            pl.BlockSpec((9, cin, tn), lambda j: (0, 0, j)),
            pl.BlockSpec((1, tn), lambda j: (0, j)),
            pl.BlockSpec((1, tn), lambda j: (0, j)),
        ],
        out_specs=pl.BlockSpec((m, tn), lambda j: (0, j)),
        compiler_params=_cparams(),
    )(xpad_nhwc, w_taps, g, b)


def _conv1x1_bn_add_relu(x, w, g, b, sc):
    m, cin = x.shape
    cout = w.shape[1]
    tn = _pick_tn(cout)
    return pl.pallas_call(
        _conv1x1_bn_add_relu_kernel,
        out_shape=(jax.ShapeDtypeStruct((m, cout), jnp.float32),
                   jax.ShapeDtypeStruct((m, cout), jnp.float32)),
        grid=(cout // tn,),
        in_specs=[
            pl.BlockSpec((m, cin), lambda j: (0, 0)),
            pl.BlockSpec((cin, tn), lambda j: (0, j)),
            pl.BlockSpec((1, tn), lambda j: (0, j)),
            pl.BlockSpec((1, tn), lambda j: (0, j)),
            pl.BlockSpec((m, tn), lambda j: (0, j)),       # shortcut tile
        ],
        out_specs=(pl.BlockSpec((m, tn), lambda j: (0, j)),
                   pl.BlockSpec((m, tn), lambda j: (0, j))),
        compiler_params=_cparams(),
    )(x, w, g, b, sc)


# ----------------------------- weight / param packing (JAX glue) ------------------------

def _pack_w1x1(w_oihw, cin_p, cout_p):
    # PyTorch OIHW (Cout, Cin, 1, 1) -> (cin_p, cout_p) bf16
    w = jnp.transpose(w_oihw[:, :, 0, 0], (1, 0))
    w = jnp.pad(w, ((0, cin_p - w.shape[0]), (0, cout_p - w.shape[1])))
    return w.astype(jnp.bfloat16)


def _pack_w3x3(w_oihw, cin_p, cout_p):
    # PyTorch OIHW (Cout, Cin, 3, 3) -> (9, cin_p, cout_p); tap k = ky*3 + kx
    w = jnp.transpose(w_oihw, (2, 3, 1, 0)).reshape(9, w_oihw.shape[1], w_oihw.shape[0])
    w = jnp.pad(w, ((0, 0), (0, cin_p - w.shape[1]), (0, cout_p - w.shape[2])))
    return w.astype(jnp.bfloat16)


def _pack_gb(gamma, beta, c_p):
    g = jnp.pad(gamma, (0, c_p - gamma.shape[0])).reshape(1, c_p).astype(jnp.float32)
    b = jnp.pad(beta, (0, c_p - beta.shape[0])).reshape(1, c_p).astype(jnp.float32)
    return g, b


def _im2col_strided(x_nhwc, stride):
    # stride>1 fallback: 9 shifted/strided slices concatenated along the contraction dim.
    n, h, w, c = x_nhwc.shape
    xp = jnp.pad(x_nhwc, ((0, 0), (1, 1), (1, 1), (0, 0)))
    ho = (h + 2 - 3) // stride + 1
    wo = (w + 2 - 3) // stride + 1
    taps = []
    for dy in range(3):
        for dx in range(3):
            sl = xp[:,
                    dy:dy + stride * (ho - 1) + 1:stride,
                    dx:dx + stride * (wo - 1) + 1:stride, :]
            taps.append(sl.reshape(n * ho * wo, c))
    return jnp.concatenate(taps, axis=-1), (n, ho, wo)


# ----------------------------- parameter init (matches nn.Module shapes) ----------------

def init_bottleneck_params(key, in_planes, planes, stride=1, base_width=64):
    width = int(planes * (base_width / 64.0))
    out_planes = _EXPANSION * planes
    ks = jax.random.split(key, 4)

    def conv_w(k, cout, cin, kh, kw):
        fan_in = cin * kh * kw
        return jax.random.normal(k, (cout, cin, kh, kw), jnp.float32) * (2.0 / fan_in) ** 0.5

    params = {
        "conv1_w": conv_w(ks[0], width, in_planes, 1, 1),
        "bn1_gamma": jnp.ones((width,), jnp.float32),
        "bn1_beta": jnp.zeros((width,), jnp.float32),
        "conv2_w": conv_w(ks[1], width, width, 3, 3),
        "bn2_gamma": jnp.ones((width,), jnp.float32),
        "bn2_beta": jnp.zeros((width,), jnp.float32),
        "conv3_w": conv_w(ks[2], out_planes, width, 1, 1),
        "bn3_gamma": jnp.ones((out_planes,), jnp.float32),
        "bn3_beta": jnp.zeros((out_planes,), jnp.float32),
    }
    if stride != 1 or in_planes != out_planes:
        params["sc_conv_w"] = conv_w(ks[3], out_planes, in_planes, 1, 1)
        params["sc_bn_gamma"] = jnp.ones((out_planes,), jnp.float32)
        params["sc_bn_beta"] = jnp.zeros((out_planes,), jnp.float32)
    return params


# ----------------------------- forward ---------------------------------------------------

def bottleneck_forward(x_nchw, params, *, in_planes, planes, stride=1, is_last=False):
    out_planes = _EXPANSION * planes
    width = params["conv1_w"].shape[0]

    x = jnp.transpose(x_nchw, (0, 2, 3, 1)).astype(jnp.float32)   # NCHW -> NHWC
    n, h, w, _ = x.shape

    cin_p = _round_up(in_planes, _LANES)
    wid_p = _round_up(width, _LANES)
    out_p = _round_up(out_planes, _LANES)

    x_p = _pad_last(x, cin_p)                 # f32, channel-padded (for identity shortcut)
    x_bf = x_p.astype(jnp.bfloat16)           # bf16 for conv inputs (halved HBM traffic)
    m_in = n * h * w

    # ---- conv1 (1x1) + bn1 + relu
    w1 = _pack_w1x1(params["conv1_w"], cin_p, wid_p)
    g1, b1 = _pack_gb(params["bn1_gamma"], params["bn1_beta"], wid_p)
    out1 = _conv1x1_bn(x_bf.reshape(m_in, cin_p), w1, g1, b1,
                       apply_relu=True, out_dtype=jnp.bfloat16)

    # ---- conv2 (3x3, pad=1, stride) + bn2 + relu
    w2 = _pack_w3x3(params["conv2_w"], wid_p, wid_p)
    g2, b2 = _pack_gb(params["bn2_gamma"], params["bn2_beta"], wid_p)
    if stride == 1:
        x2 = jnp.pad(out1.reshape(n, h, w, wid_p), ((0, 0), (1, 1), (1, 1), (0, 0)))
        out2 = _conv3x3_bn(x2, w2, g2, b2, jnp.bfloat16)          # halo kernel, no im2col
        ho, wo = h, w
    else:
        taps, (_, ho, wo) = _im2col_strided(out1.reshape(n, h, w, wid_p), stride)
        out2 = _conv1x1_bn(taps, w2.reshape(9 * wid_p, wid_p), g2, b2,
                           apply_relu=True, out_dtype=jnp.bfloat16)
    m_out = n * ho * wo

    # ---- shortcut
    if stride != 1 or in_planes != out_planes:
        x_s = x_bf[:, ::stride, ::stride, :].reshape(m_out, cin_p)
        wsc = _pack_w1x1(params["sc_conv_w"], cin_p, out_p)
        gsc, bsc = _pack_gb(params["sc_bn_gamma"], params["sc_bn_beta"], out_p)
        sc = _conv1x1_bn(x_s, wsc, gsc, bsc, apply_relu=False, out_dtype=jnp.float32)
    else:
        # identity branch implies in_planes == out_planes and stride == 1
        sc = x_p.reshape(m_out, out_p)

    # ---- conv3 (1x1) + bn3 + residual add + relu (+ preact), fused
    w3 = _pack_w1x1(params["conv3_w"], wid_p, out_p)
    g3, b3 = _pack_gb(params["bn3_gamma"], params["bn3_beta"], out_p)
    out_f, pre_f = _conv1x1_bn_add_relu(out2, w3, g3, b3, sc)

    out = jnp.transpose(out_f.reshape(n, ho, wo, out_p)[..., :out_planes], (0, 3, 1, 2))
    preact = jnp.transpose(pre_f.reshape(n, ho, wo, out_p)[..., :out_planes], (0, 3, 1, 2))
    if is_last:
        return out, preact
    return out


if __name__ == "__main__":
    key = jax.random.PRNGKey(0)
    kx, kp = jax.random.split(key)

    # Small config: in_planes=4, planes=4 -> width=4, out channels = 16; stride=1.
    in_planes, planes, stride = 4, 4, 1
    x = jax.random.normal(kx, (2, in_planes, 16, 16), jnp.float32)
    params = init_bottleneck_params(kp, in_planes, planes, stride=stride)

    out, preact = bottleneck_forward(x, params, in_planes=in_planes, planes=planes,
                                     stride=stride, is_last=True)
    jax.block_until_ready((out, preact))

    assert out.shape == (2, _EXPANSION * planes, 16, 16)
    assert preact.shape == out.shape
    assert bool(jnp.all(out >= 0.0))            # post-ReLU output is nonnegative
    assert bool(jnp.all(jnp.isfinite(preact)))
    print("KERNEL_OK")
</pallas_src>

<mosaic_0001>
module attributes {stable_mosaic.version = 11 : i64} {
  func.func @_conv1x1_bn_kernel(%arg0: i32, %arg1: memref<512x128xbf16, #tpu.memory_space<vmem>>, %arg2: memref<128x128xbf16, #tpu.memory_space<vmem>>, %arg3: memref<1x128xf32, #tpu.memory_space<vmem>>, %arg4: memref<1x128xf32, #tpu.memory_space<vmem>>, %arg5: memref<512x128xbf16, #tpu.memory_space<vmem>>) attributes {dimension_semantics = [#tpu.dimension_semantics<parallel>], iteration_bounds = array<i64: 1>, scalar_prefetch = 0 : i64, scratch_operands = 0 : i64, tpu.core_type = #tpu.core_type<tc>, window_params = [{pipeline_mode = #tpu.pipeline_mode<synchronous>, transform_indices = @transform_0, window_bounds = array<i64: 512, 128>}, {transform_indices = @transform_1, window_bounds = array<i64: 128, 128>}, {transform_indices = @transform_2, window_bounds = array<i64: 1, 128>}, {transform_indices = @transform_3, window_bounds = array<i64: 1, 128>}, {transform_indices = @transform_4, window_bounds = array<i64: 512, 128>}]} {
    %c0 = arith.constant 0 : index
    %c0_0 = arith.constant 0 : index
    %0 = vector.load %arg1[%c0, %c0_0] : memref<512x128xbf16, #tpu.memory_space<vmem>>, vector<512x128xbf16>
    %c0_1 = arith.constant 0 : index
    %c0_2 = arith.constant 0 : index
    %1 = vector.load %arg2[%c0_1, %c0_2] : memref<128x128xbf16, #tpu.memory_space<vmem>>, vector<128x128xbf16>
    %cst = arith.constant dense<0.000000e+00> : vector<512x128xf32>
    %2 = tpu.matmul %0, %1, %cst {dimension_numbers = #tpu.dot_dimension_numbers<[1], [0], [0], [1], [0, 0, 1, 1], [], []>} : vector<512x128xbf16>, vector<128x128xbf16>, vector<512x128xf32> -> vector<512x128xf32>
    %c0_3 = arith.constant 0 : index
    %c0_4 = arith.constant 0 : index
    %3 = vector.load %arg3[%c0_3, %c0_4] : memref<1x128xf32, #tpu.memory_space<vmem>>, vector<1x128xf32>
    %c0_5 = arith.constant 0 : index
    %c0_6 = arith.constant 0 : index
    %4 = vector.load %arg4[%c0_5, %c0_6] : memref<1x128xf32, #tpu.memory_space<vmem>>, vector<1x128xf32>
    %cst_7 = arith.constant dense<0.000000e+00> : vector<128xf32>
    %5 = vector.multi_reduction <add>, %2, %cst_7 [0] : vector<512x128xf32> to vector<128xf32>
    %6 = vector.shape_cast %5 : vector<128xf32> to vector<1x128xf32>
    %cst_8 = arith.constant 0.001953125 : f32
    %7 = vector.broadcast %cst_8 : f32 to vector<1x128xf32>
    %8 = arith.mulf %6, %7 : vector<1x128xf32>
    %9 = arith.mulf %2, %2 : vector<512x128xf32>
    %cst_9 = arith.constant dense<0.000000e+00> : vector<128xf32>
    %10 = vector.multi_reduction <add>, %9, %cst_9 [0] : vector<512x128xf32> to vector<128xf32>
    %11 = vector.shape_cast %10 : vector<128xf32> to vector<1x128xf32>
    %cst_10 = arith.constant 0.001953125 : f32
    %12 = vector.broadcast %cst_10 : f32 to vector<1x128xf32>
    %13 = arith.mulf %11, %12 : vector<1x128xf32>
    %14 = arith.mulf %8, %8 : vector<1x128xf32>
    %15 = arith.subf %13, %14 : vector<1x128xf32>
    %cst_11 = arith.constant 0.000000e+00 : f32
    %16 = vector.broadcast %cst_11 : f32 to vector<1x128xf32>
    %17 = arith.maximumf %15, %16 : vector<1x128xf32>
    %cst_12 = arith.constant 9.99999974E-6 : f32
    %18 = vector.broadcast %cst_12 : f32 to vector<1x128xf32>
    %19 = arith.addf %17, %18 : vector<1x128xf32>
    %20 = math.rsqrt %19 : vector<1x128xf32>
    %21 = arith.mulf %3, %20 : vector<1x128xf32>
    %22 = arith.mulf %8, %21 : vector<1x128xf32>
    %23 = arith.subf %4, %22 : vector<1x128xf32>
    %24 = vector.broadcast %21 : vector<1x128xf32> to vector<512x128xf32>
    %25 = arith.mulf %2, %24 : vector<512x128xf32>
    %26 = vector.broadcast %23 : vector<1x128xf32> to vector<512x128xf32>
    %27 = arith.addf %25, %26 : vector<512x128xf32>
    %cst_13 = arith.constant 0.000000e+00 : f32
    %28 = vector.broadcast %cst_13 : f32 to vector<512x128xf32>
    %29 = arith.maximumf %27, %28 : vector<512x128xf32>
    %30 = arith.truncf %29 : vector<512x128xf32> to vector<512x128xbf16>
    %c0_14 = arith.constant 0 : index
    %c0_15 = arith.constant 0 : index
    %31 = vector.load %arg5[%c0_14, %c0_15] : memref<512x128xbf16, #tpu.memory_space<vmem>>, vector<512x128xbf16>
    tpu.vector_store %arg5[%c0_14, %c0_15], %30 {strides = array<i32>} : memref<512x128xbf16, #tpu.memory_space<vmem>>, vector<512x128xbf16>,
    return
  }
  func.func @transform_0(%arg0: i32) -> (i32, i32) {
    %c0_i32 = arith.constant 0 : i32
    %c0_i32_0 = arith.constant 0 : i32
    %c0_i32_1 = arith.constant 0 : i32
    return %c0_i32, %c0_i32_0 : i32, i32
  }
  func.func @transform_1(%arg0: i32) -> (i32, i32) {
    %c0_i32 = arith.constant 0 : i32
    %c0_i32_0 = arith.constant 0 : i32
    return %c0_i32, %arg0 : i32, i32
  }
  func.func @transform_2(%arg0: i32) -> (i32, i32) {
    %c0_i32 = arith.constant 0 : i32
    %c0_i32_0 = arith.constant 0 : i32
    return %c0_i32, %arg0 : i32, i32
  }
  func.func @transform_3(%arg0: i32) -> (i32, i32) {
    %c0_i32 = arith.constant 0 : i32
    %c0_i32_0 = arith.constant 0 : i32
    return %c0_i32, %arg0 : i32, i32
  }
  func.func @transform_4(%arg0: i32) -> (i32, i32) {
    %c0_i32 = arith.constant 0 : i32
    %c0_i32_0 = arith.constant 0 : i32
    return %c0_i32, %arg0 : i32, i32
  }
}

</mosaic_0001>

<bundles_post_ra>
// kernel: tpu_custom_call.1
= control target key start
LH: loop header
LB: loop body
LE: loop exit
PB: predicated region body
PF: predicated region fallthrough
CT: control target
= control target key end

     0   :  { %9 = vsyncpa [#allocation3], 0  ;;  %s2902_s0 = inlined_call_operand.hbm [shape: bf16[512,128], index: 0, kind: input, shape index: {}]   ;;  %s2903_s1 = inlined_call_operand.hbm [shape: bf16[128,128], index: 1, kind: input, shape index: {}]   ;;  %s2904_s2 = inlined_call_operand.vmem [shape: f32[1,128], index: 2, kind: input, shape index: {}]   ;;  %s2905_s3 = inlined_call_operand.vmem [shape: f32[1,128], index: 3, kind: input, shape index: {}]   ;;  %s2906_s4 = inlined_call_operand.hbm [shape: bf16[512,128], index: 4, kind: output, shape index: {}]  }
   0x1   :  { %10 = vsyncpa [#allocation6], 0 }
   0x2   :  { %11 = vsyncpa [#allocation4], 0  ;;  %s2026_s15 = smov [#allocation2]   ;;  %s1954_s19 = scalar_lea.hbm %s2902_s0, 4096 }
   0x3   :  { %s17_s16 = sshll.u32 %s2026_s15, 4  ;;  %p1955_p0 = scmp.ne.s32.totalorder %s2902_s0, %s1954_s19  ;;  %s18_s16 = int_to_ptr.vmem [resolvable:$true] %s17_s16 }
   0x4   :  { %p1958_p1 = scmp.lt.u32.totalorder %s1954_s19, %s2902_s0 }
   0x6   :  { %p1960_p2 = pnand %p1958_p1, %p1955_p0 }
   0x8   :  { %1963 = shalt.err (!%p1960_p2)
}
   0x9   :  { %s1964_s24 = scalar_lea.vmem %s18_s16, 4096  ;;  %p1969_p4 = scmp.lt.s32.totalorder %s18_s16, %s18_s16 }
   0xa   :  { %p1965_p3 = scmp.ne.s32.totalorder %s18_s16, %s1964_s24  ;;  %p1970_p5 = scmp.lt.s32.totalorder %s1964_s24, %s1964_s24 }
   0xc   :  { %p1971_p6 = por %p1970_p5, %p1969_p4 }
   0xe   :  { %p1972_p7 = pnand %p1971_p6, %p1965_p3 }
  0x10   :  { %1975 = shalt.err (!%p1972_p7)
}
  0x11   :  { %s2027_s25 = smov 64   ;;  %s2028_s26 = smov 4  }
  0x12   :  { %23 = dma.hbm_to_vmem [thread:$0]  %s2902_s0, 4096, %s18_s16, [#allocation3], %s2027_s25, %s2027_s25, %s2028_s26  }
  0x13   :  { %s2029_s29 = smov [#allocation5]   ;;  %s1976_s7 = scalar_lea.hbm %s2903_s1, 1024 }
  0x14   :  { %s29_s30 = sshll.u32 %s2029_s29, 4  ;;  %p1977_p8 = scmp.ne.s32.totalorder %s2903_s1, %s1976_s7  ;;  %s30_s30 = int_to_ptr.vmem [resolvable:$true] %s29_s30 }
  0x15   :  { %p1980_p9 = scmp.lt.u32.totalorder %s1976_s7, %s2903_s1 }
  0x17   :  { %p1982_p10 = pnand %p1980_p9, %p1977_p8 }
  0x19   :  { %1985 = shalt.err (!%p1982_p10)
}
  0x1a   :  { %s1986_s12 = scalar_lea.vmem %s30_s30, 1024  ;;  %p1991_p12 = scmp.lt.s32.totalorder %s30_s30, %s30_s30 }
  0x1b   :  { %p1987_p11 = scmp.ne.s32.totalorder %s30_s30, %s1986_s12  ;;  %p1992_p13 = scmp.lt.s32.totalorder %s1986_s12, %s1986_s12 }
  0x1d   :  { %p1993_p0 = por %p1992_p13, %p1991_p12 }
  0x1f   :  { %p1994_p1 = pnand %p1993_p0, %p1987_p11 }
  0x21   :  { %1997 = shalt.err (!%p1994_p1)
}
  0x22   :  { %35 = dma.hbm_to_vmem [thread:$0]  %s2903_s1, 1024, %s30_s30, [#allocation6], %s2027_s25, %s2027_s25, %s2028_s26  }
  0x23   :  { %2020 = dma.done.wait [#allocation3], 4096  }
  0x24   :  { %2021 = vsyncadd [#allocation3], 4294963200 }
  0x25   :  { %2022 = dma.done.wait [#allocation6], 1024  }
  0x26   :  { %2023 = vsyncadd [#allocation6], 4294966272  ;;  %v1912_v0 = vld [vmem:[#allocation5] sm:$0xff]   ;;  %v1913_v1 = vld [vmem:[#allocation5 + $0x8] sm:$0xff]  }
  0x27   :  { %1811 = vmatprep.subr.bf16.mxu0 %v1912_v0  ;;  %1891 = vmatprep.subr.bf16.mxu1 %v1912_v0  ;;  %v1914_v2 = vld [vmem:[#allocation5 + $0x10] sm:$0xff]   ;;  %v1915_v3 = vld [vmem:[#allocation5 + $0x18] sm:$0xff]   ;;  %v1920_v4 = vld [vmem:[#allocation2] sm:$0xff]  }
  0x28   :  { %1812 = vmatpush3.bf16.msra.mxu0 %v1912_v0  ;;  %1899 = vmatpush3.bf16.msra.mxu1 %v1912_v0  ;;  %v1916_v5 = vld [vmem:[#allocation5 + $0x20] sm:$0xff]   ;;  %v1917_v6 = vld [vmem:[#allocation5 + $0x28] sm:$0xff]   ;;  %v1918_v7 = vld [vmem:[#allocation5 + $0x30] sm:$0xff]  }
  0x29   :  { %1813 = vmatprep.subr.bf16.mxu0 %v1913_v1  ;;  %1892 = vmatprep.subr.bf16.mxu1 %v1913_v1  ;;  %v1919_v8 = vld [vmem:[#allocation5 + $0x38] sm:$0xff]   ;;  %v1936_v9 = vld [vmem:[#allocation2 + $0x80] sm:$0xff]   ;;  %v1921_v10 = vld [vmem:[#allocation2 + $0x8] sm:$0xff]  }
  0x2a   :  { %1827 = vmatprep.mubr.bf16.mxu0 %v1920_v4  ;;  %1859 = vmatprep.mubr.bf16.mxu1 %v1936_v9  ;;  %v1922_v11 = vld [vmem:[#allocation2 + $0x10] sm:$0xff]   ;;  %v1937_v12 = vld [vmem:[#allocation2 + $0x88] sm:$0xff]   ;;  %v1923_v14 = vld [vmem:[#allocation2 + $0x18] sm:$0xff]  }
  0x2b   :  { %v1938_v13 = vld [vmem:[#allocation2 + $0x90] sm:$0xff]   ;;  %v1924_v15 = vld [vmem:[#allocation2 + $0x20] sm:$0xff]   ;;  %v1939_v16 = vld [vmem:[#allocation2 + $0x98] sm:$0xff]  }
  0x2c   :  { %1814 = vmatpush3.bf16.msra.mxu0 %v1913_v1  ;;  %1900 = vmatpush3.bf16.msra.mxu1 %v1913_v1  ;;  %v1940_v17 = vld [vmem:[#allocation2 + $0xa0] sm:$0xff]   ;;  %v1925_v18 = vld [vmem:[#allocation2 + $0x28] sm:$0xff]   ;;  %v1926_v20 = vld [vmem:[#allocation2 + $0x30] sm:$0xff]  }
  0x2d   :  { %1815 = vmatprep.subr.bf16.mxu0 %v1914_v2  ;;  %1893 = vmatprep.subr.bf16.mxu1 %v1914_v2  ;;  %v1941_v19 = vld [vmem:[#allocation2 + $0xa8] sm:$0xff]   ;;  %v1942_v21 = vld [vmem:[#allocation2 + $0xb0] sm:$0xff]   ;;  %v1927_v22 = vld [vmem:[#allocation2 + $0x38] sm:$0xff]  }
  0x2e   :  { %v1943_v23 = vld [vmem:[#allocation2 + $0xb8] sm:$0xff]   ;;  %v1928_v24 = vld [vmem:[#allocation2 + $0x40] sm:$0xff]   ;;  %v1929_v26 = vld [vmem:[#allocation2 + $0x48] sm:$0xff]  }
  0x2f   :  { %v1944_v25 = vld [vmem:[#allocation2 + $0xc0] sm:$0xff]   ;;  %v1945_v27 = vld [vmem:[#allocation2 + $0xc8] sm:$0xff]   ;;  %v1930_v28 = vld [vmem:[#allocation2 + $0x50] sm:$0xff]  }
  0x30   :  { %1816 = vmatpush3.bf16.msra.mxu0 %v1914_v2  ;;  %1901 = vmatpush3.bf16.msra.mxu1 %v1914_v2  ;;  %v1946_v29 = vld [vmem:[#allocation2 + $0xd0] sm:$0xff]   ;;  %v1931_v30 = vld [vmem:[#allocation2 + $0x58] sm:$0xff]   ;;  %v1932_v32 = vld [vmem:[#allocation2 + $0x60] sm:$0xff]  }
  0x31   :  { %1817 = vmatprep.subr.bf16.mxu0 %v1915_v3  ;;  %1894 = vmatprep.subr.bf16.mxu1 %v1915_v3  ;;  %v1947_v31 = vld [vmem:[#allocation2 + $0xd8] sm:$0xff]   ;;  %v1948_v33 = vld [vmem:[#allocation2 + $0xe0] sm:$0xff]   ;;  %v1933_v34 = vld [vmem:[#allocation2 + $0x68] sm:$0xff]  }
  0x32   :  { %v1949_v35 = vld [vmem:[#allocation2 + $0xe8] sm:$0xff]   ;;  %v1934_v36 = vld [vmem:[#allocation2 + $0x70] sm:$0xff]   ;;  %v1935_v38 = vld [vmem:[#allocation2 + $0x78] sm:$0xff]  }
  0x33   :  { %v1950_v37 = vld [vmem:[#allocation2 + $0xf0] sm:$0xff]   ;;  %v1951_v39 = vld [vmem:[#allocation2 + $0xf8] sm:$0xff]  }
  0x34   :  { %1818 = vmatpush3.bf16.msra.mxu0 %v1915_v3  ;;  %1902 = vmatpush3.bf16.msra.mxu1 %v1915_v3 }
  0x35   :  { %1819 = vmatprep.subr.bf16.mxu0 %v1916_v5  ;;  %1895 = vmatprep.subr.bf16.mxu1 %v1916_v5 }
  0x38   :  { %1820 = vmatpush3.bf16.msra.mxu0 %v1916_v5  ;;  %1903 = vmatpush3.bf16.msra.mxu1 %v1916_v5 }
  0x39   :  { %1821 = vmatprep.subr.bf16.mxu0 %v1917_v6  ;;  %1896 = vmatprep.subr.bf16.mxu1 %v1917_v6 }
  0x3c   :  { %1822 = vmatpush3.bf16.msra.mxu0 %v1917_v6  ;;  %1904 = vmatpush3.bf16.msra.mxu1 %v1917_v6 }
  0x3d   :  { %1823 = vmatprep.subr.bf16.mxu0 %v1918_v7  ;;  %1897 = vmatprep.subr.bf16.mxu1 %v1918_v7 }
  0x40   :  { %1824 = vmatpush3.bf16.msra.mxu0 %v1918_v7  ;;  %1905 = vmatpush3.bf16.msra.mxu1 %v1918_v7 }
  0x41   :  { %1825 = vmatprep.subr.bf16.mxu0 %v1919_v8  ;;  %1898 = vmatprep.subr.bf16.mxu1 %v1919_v8 }
  0x44   :  { %1826 = vmatpush3.bf16.msra.mxu0 %v1919_v8  ;;  %1906 = vmatpush3.bf16.msra.mxu1 %v1919_v8 }
  0x47   :  { %1828 = vmatmul.mubr.bf16.vlgmr.msra.gmra.mrb[0].mxu0 %v1921_v10  ;;  %1860 = vmatmul.mubr.bf16.vlgmr.msra.gmra.mrb[0].mxu1 %v1937_v12 }
  0x48   :  { %1831 = vmatprep.mubr.bf16.mxu0 %v1922_v11  ;;  %1863 = vmatprep.mubr.bf16.mxu1 %v1938_v13 }
  0x4f   :  { %1832 = vmatmul.mubr.bf16.gmra.mrb[4].mxu0 %v1923_v14  ;;  %1864 = vmatmul.mubr.bf16.gmra.mrb[4].mxu1 %v1939_v16 }
  0x50   :  { %1835 = vmatprep.mubr.bf16.mxu0 %v1924_v15  ;;  %1867 = vmatprep.mubr.bf16.mxu1 %v1940_v17 }
  0x57   :  { %1836 = vmatmul.mubr.bf16.gmra.mrb[8].mxu0 %v1925_v18  ;;  %1868 = vmatmul.mubr.bf16.gmra.mrb[8].mxu1 %v1941_v19 }
  0x58   :  { %1839 = vmatprep.mubr.bf16.mxu0 %v1926_v20  ;;  %1871 = vmatprep.mubr.bf16.mxu1 %v1942_v21 }
  0x5f   :  { %1840 = vmatmul.mubr.bf16.gmra.mrb[12].mxu0 %v1927_v22  ;;  %1872 = vmatmul.mubr.bf16.gmra.mrb[12].mxu1 %v1943_v23 }
  0x60   :  { %1843 = vmatprep.mubr.bf16.mxu0 %v1928_v24  ;;  %1875 = vmatprep.mubr.bf16.mxu1 %v1944_v25 }
  0x67   :  { %1844 = vmatmul.mubr.bf16.gmra.mrb[16].mxu0 %v1929_v26  ;;  %1876 = vmatmul.mubr.bf16.gmra.mrb[16].mxu1 %v1945_v27 }
  0x68   :  { %1847 = vmatprep.mubr.bf16.mxu0 %v1930_v28  ;;  %1879 = vmatprep.mubr.bf16.mxu1 %v1946_v29 }
  0x6f   :  { %1848 = vmatmul.mubr.bf16.gmra.mrb[20].mxu0 %v1931_v30  ;;  %1880 = vmatmul.mubr.bf16.gmra.mrb[20].mxu1 %v1947_v31 }
  0x70   :  { %1851 = vmatprep.mubr.bf16.mxu0 %v1932_v32  ;;  %1883 = vmatprep.mubr.bf16.mxu1 %v1948_v33 }
  0x77   :  { %1852 = vmatmul.mubr.bf16.gmra.mrb[24].mxu0 %v1933_v34  ;;  %1884 = vmatmul.mubr.bf16.gmra.mrb[24].mxu1 %v1949_v35 }
  0x78   :  { %1855 = vmatprep.mubr.bf16.mxu0 %v1934_v36  ;;  %1887 = vmatprep.mubr.bf16.mxu1 %v1950_v37 }
  0x7f   :  { %1856 = vmatmul.mubr.bf16.gmra.mrb[28].mxu0 %v1935_v38  ;;  %1888 = vmatmul.mubr.bf16.gmra.mrb[28].mxu1 %v1951_v39 }
 0x11a   :  { %v2086_v40 = vpop.f32.mrb[0].mxu0  ;;  %v2088_v41 = vpop.f32.mrb[0].mxu1 }
 0x11b   :  { %v2090_v42 = vpop.f32.mrb[1].mxu0  ;;  %v2092_v43 = vpop.f32.mrb[1].mxu1  ;;  %v730_v51 = vmul.f32 %v2086_v40, %v2086_v40 }
 0x11c   :  { %v2094_v44 = vpop.f32.mrb[2].mxu0  ;;  %v2096_v45 = vpop.f32.mrb[2].mxu1  ;;  %v728_v48 = vmul.f32 %v2090_v42, %v2090_v42 }
 0x11d   :  { %v2098_v46 = vpop.f32.mrb[3].mxu0  ;;  %v2100_v47 = vpop.f32.mrb[3].mxu1  ;;  %v731_v54 = vmul.f32 %v2094_v44, %v2094_v44 }
 0x11e   :  { %v658_v49 = vadd.f32 %v2098_v46, %v2090_v42  ;;  %v729_v50 = vmul.f32 %v2098_v46, %v2098_v46 }
 0x120   :  { %v659_v52 = vadd.f32 %v2086_v40, %v658_v49  ;;  %v792_v53 = vadd.f32 %v729_v50, %v728_v48 }
 0x122   :  { %v793_v55 = vadd.f32 %v792_v53, %v730_v51  ;;  %v2113_v56 = vpop.f32.mrb[4].mxu0  ;;  %v660_v57 = vadd.f32 %v2094_v44, %v659_v52  ;;  %v2116_v58 = vpop.f32.mrb[4].mxu1 }
 0x123   :  { %v2118_v59 = vpop.f32.mrb[5].mxu0  ;;  %v2120_v60 = vpop.f32.mrb[5].mxu1  ;;  %v734_v7 = vmul.f32 %v2113_v56, %v2113_v56 }
 0x124   :  { %v661_v61 = vadd.f32 %v660_v57, %v2118_v59  ;;  %v732_v62 = vmul.f32 %v2118_v59, %v2118_v59  ;;  %v794_v63 = vadd.f32 %v793_v55, %v731_v54  ;;  %v2125_v0 = vpop.f32.mrb[6].mxu0  ;;  %v2127_v1 = vpop.f32.mrb[6].mxu1 }
 0x125   :  { %v2129_v2 = vpop.f32.mrb[7].mxu0  ;;  %v2131_v3 = vpop.f32.mrb[7].mxu1  ;;  %v735_v10 = vmul.f32 %v2125_v0, %v2125_v0 }
 0x126   :  { %v795_v4 = vadd.f32 %v794_v63, %v732_v62  ;;  %v662_v5 = vadd.f32 %v661_v61, %v2129_v2  ;;  %v733_v6 = vmul.f32 %v2129_v2, %v2129_v2 }
 0x128   :  { %v663_v8 = vadd.f32 %v2113_v56, %v662_v5  ;;  %v796_v9 = vadd.f32 %v795_v4, %v733_v6 }
 0x12a   :  { %v797_v11 = vadd.f32 %v796_v9, %v734_v7  ;;  %v2141_v12 = vpop.f32.mrb[8].mxu0  ;;  %v664_v13 = vadd.f32 %v2125_v0, %v663_v8  ;;  %v2144_v14 = vpop.f32.mrb[8].mxu1 }
 0x12b   :  { %v2146_v15 = vpop.f32.mrb[9].mxu0  ;;  %v2148_v16 = vpop.f32.mrb[9].mxu1  ;;  %v738_v27 = vmul.f32 %v2141_v12, %v2141_v12 }
 0x12c   :  { %v665_v17 = vadd.f32 %v664_v13, %v2146_v15  ;;  %v736_v18 = vmul.f32 %v2146_v15, %v2146_v15  ;;  %v798_v19 = vadd.f32 %v797_v11, %v735_v10  ;;  %v2153_v20 = vpop.f32.mrb[10].mxu0  ;;  %v2155_v21 = vpop.f32.mrb[10].mxu1 }
 0x12d   :  { %v2157_v22 = vpop.f32.mrb[11].mxu0  ;;  %v2159_v23 = vpop.f32.mrb[11].mxu1  ;;  %v739_v30 = vmul.f32 %v2153_v20, %v2153_v20 }
 0x12e   :  { %v799_v24 = vadd.f32 %v798_v19, %v736_v18  ;;  %v666_v25 = vadd.f32 %v665_v17, %v2157_v22  ;;  %v737_v26 = vmul.f32 %v2157_v22, %v2157_v22 }
 0x130   :  { %v667_v28 = vadd.f32 %v2141_v12, %v666_v25  ;;  %v800_v29 = vadd.f32 %v799_v24, %v737_v26 }
 0x132   :  { %v801_v31 = vadd.f32 %v800_v29, %v738_v27  ;;  %v2169_v32 = vpop.f32.mrb[12].mxu0  ;;  %v668_v33 = vadd.f32 %v2153_v20, %v667_v28  ;;  %v2172_v34 = vpop.f32.mrb[12].mxu1 }
 0x133   :  { %v2174_v35 = vpop.f32.mrb[13].mxu0  ;;  %v2176_v36 = vpop.f32.mrb[13].mxu1  ;;  %v742_v55 = vmul.f32 %v2169_v32, %v2169_v32 }
 0x134   :  { %v669_v37 = vadd.f32 %v668_v33, %v2174_v35  ;;  %v740_v38 = vmul.f32 %v2174_v35, %v2174_v35  ;;  %v802_v39 = vadd.f32 %v801_v31, %v739_v30  ;;  %v2181_v48 = vpop.f32.mrb[14].mxu0  ;;  %v2183_v49 = vpop.f32.mrb[14].mxu1 }
 0x135   :  { %2931 = vst [vmem:[#allocation11_spill] sm:$0xff] %v2181_v48  ;;  %v2185_v50 = vpop.f32.mrb[15].mxu0  ;;  %v2187_v51 = vpop.f32.mrb[15].mxu1  ;;  %v743_v62 = vmul.f32 %v2181_v48, %v2181_v48 }
 0x136   :  { %v803_v52 = vadd.f32 %v802_v39, %v740_v38  ;;  %v670_v53 = vadd.f32 %v669_v37, %v2185_v50  ;;  %v741_v54 = vmul.f32 %v2185_v50, %v2185_v50 }
 0x138   :  { %v671_v57 = vadd.f32 %v2169_v32, %v670_v53  ;;  %v804_v61 = vadd.f32 %v803_v52, %v741_v54 }
 0x13a   :  { %v805_v63 = vadd.f32 %v804_v61, %v742_v55  ;;  %v2197_v4 = vpop.f32.mrb[16].mxu0  ;;  %v672_v5 = vadd.f32 %v2181_v48, %v671_v57  ;;  %v2200_v6 = vpop.f32.mrb[16].mxu1  ;;  %v761_v48 = vmul.f32 %v2100_v47, %v2100_v47 }
 0x13b   :  { %2932 = vst [vmem:[#allocation12_spill] sm:$0xff] %v2197_v4  ;;  %v2202_v7 = vpop.f32.mrb[17].mxu0  ;;  %v2204_v8 = vpop.f32.mrb[17].mxu1  ;;  %v746_v27 = vmul.f32 %v2197_v4, %v2197_v4 }
 0x13c   :  { %2933 = vst [vmem:[#allocation13_spill] sm:$0xff] %v2202_v7  ;;  %v673_v9 = vadd.f32 %v672_v5, %v2202_v7  ;;  %v744_v10 = vmul.f32 %v2202_v7, %v2202_v7  ;;  %v806_v11 = vadd.f32 %v805_v63, %v743_v62  ;;  %v2209_v13 = vpop.f32.mrb[18].mxu0  ;;  %v2211_v17 = vpop.f32.mrb[18].mxu1 }
 0x13d   :  { %2934 = vst [vmem:[#allocation14_spill] sm:$0xff] %v2209_v13  ;;  %v2213_v18 = vpop.f32.mrb[19].mxu0  ;;  %v2215_v19 = vpop.f32.mrb[19].mxu1  ;;  %v747_v30 = vmul.f32 %v2209_v13, %v2209_v13 }
 0x13e   :  { %2935 = vst [vmem:[#allocation15_spill] sm:$0xff] %v2213_v18  ;;  %v807_v24 = vadd.f32 %v806_v11, %v744_v10  ;;  %v674_v25 = vadd.f32 %v673_v9, %v2213_v18  ;;  %v745_v26 = vmul.f32 %v2213_v18, %v2213_v18 }
 0x140   :  { %v675_v28 = vadd.f32 %v2197_v4, %v674_v25  ;;  %v808_v29 = vadd.f32 %v807_v24, %v745_v26 }
 0x142   :  { %v809_v31 = vadd.f32 %v808_v29, %v746_v27  ;;  %v2225_v33 = vpop.f32.mrb[20].mxu0  ;;  %v676_v37 = vadd.f32 %v2209_v13, %v675_v28  ;;  %v2228_v38 = vpop.f32.mrb[20].mxu1 }
 0x143   :  { %2936 = vst [vmem:[#allocation16_spill] sm:$0xff] %v2225_v33  ;;  %2937 = vst [vmem:[#allocation17_spill] sm:$0xff] %v2228_v38  ;;  %v2230_v39 = vpop.f32.mrb[21].mxu0  ;;  %v2232_v52 = vpop.f32.mrb[21].mxu1  ;;  %v750_v11 = vmul.f32 %v2225_v33, %v2225_v33 }
 0x144   :  { %2938 = vst [vmem:[#allocation18_spill] sm:$0xff] %v2230_v39  ;;  %2939 = vst [vmem:[#allocation19_spill] sm:$0xff] %v2232_v52  ;;  %v677_v53 = vadd.f32 %v676_v37, %v2230_v39  ;;  %v748_v54 = vmul.f32 %v2230_v39, %v2230_v39  ;;  %v810_v55 = vadd.f32 %v809_v31, %v747_v30  ;;  %v2237_v57 = vpop.f32.mrb[22].mxu0  ;;  %v2239_v61 = vpop.f32.mrb[22].mxu1 }
 0x145   :  { %2940 = vst [vmem:[#allocation20_spill] sm:$0xff] %v2237_v57  ;;  %2941 = vst [vmem:[#allocation21_spill] sm:$0xff] %v2239_v61  ;;  %v2241_v62 = vpop.f32.mrb[23].mxu0  ;;  %v2243_v63 = vpop.f32.mrb[23].mxu1  ;;  %v751_v26 = vmul.f32 %v2237_v57, %v2237_v57 }
 0x146   :  { %2942 = vst [vmem:[#allocation22_spill] sm:$0xff] %v2241_v62  ;;  %2943 = vst [vmem:[#allocation23_spill] sm:$0xff] %v2243_v63  ;;  %v811_v5 = vadd.f32 %v810_v55, %v748_v54  ;;  %v678_v9 = vadd.f32 %v677_v53, %v2241_v62  ;;  %v749_v10 = vmul.f32 %v2241_v62, %v2241_v62 }
 0x148   :  { %v679_v24 = vadd.f32 %v2225_v33, %v678_v9  ;;  %v812_v25 = vadd.f32 %v811_v5, %v749_v10 }
 0x14a   :  { %v813_v27 = vadd.f32 %v812_v25, %v750_v11  ;;  %v2253_v28 = vpop.f32.mrb[24].mxu0  ;;  %v680_v29 = vadd.f32 %v2237_v57, %v679_v24  ;;  %v2256_v30 = vpop.f32.mrb[24].mxu1 }
 0x14b   :  { %2944 = vst [vmem:[#allocation24_spill] sm:$0xff] %v2253_v28  ;;  %2945 = vst [vmem:[#allocation25_spill] sm:$0xff] %v2256_v30  ;;  %v2258_v31 = vpop.f32.mrb[25].mxu0  ;;  %v2260_v37 = vpop.f32.mrb[25].mxu1 }
 0x14c   :  { %2946 = vst [vmem:[#allocation26_spill] sm:$0xff] %v2258_v31  ;;  %2947 = vst [vmem:[#allocation27_spill] sm:$0xff] %v2260_v37  ;;  %v681_v53 = vadd.f32 %v680_v29, %v2258_v31  ;;  %v752_v54 = vmul.f32 %v2258_v31, %v2258_v31  ;;  %v814_v55 = vadd.f32 %v813_v27, %v751_v26  ;;  %v2265_v5 = vpop.f32.mrb[26].mxu0  ;;  %v2267_v9 = vpop.f32.mrb[26].mxu1 }
 0x14d   :  { %2948 = vst [vmem:[#allocation28_spill] sm:$0xff] %v2265_v5  ;;  %2949 = vst [vmem:[#allocation29_spill] sm:$0xff] %v2267_v9  ;;  %v2269_v10 = vpop.f32.mrb[27].mxu0  ;;  %v2271_v11 = vpop.f32.mrb[27].mxu1  ;;  %v754_v29 = vmul.f32 %v2253_v28, %v2253_v28  ;;  %v755_v27 = vmul.f32 %v2265_v5, %v2265_v5 }
 0x14e   :  { %2950 = vst [vmem:[#allocation30_spill] sm:$0xff] %v2269_v10  ;;  %2951 = vst [vmem:[#allocation31_spill] sm:$0xff] %v2271_v11  ;;  %v815_v24 = vadd.f32 %v814_v55, %v752_v54  ;;  %v682_v25 = vadd.f32 %v681_v53, %v2269_v10  ;;  %v753_v57 = vmul.f32 %v2269_v10, %v2269_v10 }
 0x150   :  { %v683_v31 = vadd.f32 %v2253_v28, %v682_v25  ;;  %v816_v26 = vadd.f32 %v815_v24, %v753_v57 }
 0x152   :  { %v817_v33 = vadd.f32 %v816_v26, %v754_v29  ;;  %v2281_v62 = vpop.f32.mrb[28].mxu0  ;;  %v684_v39 = vadd.f32 %v2265_v5, %v683_v31  ;;  %v2284_v54 = vpop.f32.mrb[28].mxu1 }
 0x153   :  { %2952 = vst [vmem:[#allocation32_spill] sm:$0xff] %v2284_v54  ;;  %v2286_v53 = vpop.f32.mrb[29].mxu0  ;;  %v2288_v55 = vpop.f32.mrb[29].mxu1 }
 0x154   :  { %2953 = vst [vmem:[#allocation33_spill] sm:$0xff] %v2286_v53  ;;  %v685_v10 = vadd.f32 %v684_v39, %v2286_v53  ;;  %v756_v25 = vmul.f32 %v2286_v53, %v2286_v53  ;;  %v818_v57 = vadd.f32 %v817_v33, %v755_v27  ;;  %v2293_v24 = vpop.f32.mrb[30].mxu0  ;;  %v2295_v28 = vpop.f32.mrb[30].mxu1  ;;  %v758_v39 = vmul.f32 %v2281_v62, %v2281_v62 }
 0x155   :  { %v2297_v29 = vpop.f32.mrb[31].mxu0  ;;  %v2299_v26 = vpop.f32.mrb[31].mxu1  ;;  %v759_v27 = vmul.f32 %v2293_v24, %v2293_v24 }
 0x156   :  { %2954 = vst [vmem:[#allocation34_spill] sm:$0xff] %v2297_v29  ;;  %v819_v31 = vadd.f32 %v818_v57, %v756_v25  ;;  %v686_v5 = vadd.f32 %v685_v10, %v2297_v29  ;;  %v757_v13 = vmul.f32 %v2297_v29, %v2297_v29  ;;  %v760_v25 = vmul.f32 %v2092_v43, %v2092_v43 }
 0x158   :  { %v687_v53 = vadd.f32 %v2281_v62, %v686_v5  ;;  %v820_v33 = vadd.f32 %v819_v31, %v757_v13  ;;  %v762_v13 = vmul.f32 %v2088_v41, %v2088_v41 }
 0x15a   :  { %v821_v4 = vadd.f32 %v820_v33, %v758_v39  ;;  %v688_v18 = vadd.f32 %v2293_v24, %v687_v53  ;;  %v763_v53 = vmul.f32 %v2096_v45, %v2096_v45 }
 0x15c   :  { %v689_v10 = vadd.f32 %v688_v18, %v2092_v43  ;;  %v822_v57 = vadd.f32 %v821_v4, %v759_v27  ;;  %v764_v4 = vmul.f32 %v2120_v60, %v2120_v60 }
 0x15e   :  { %v823_v7 = vadd.f32 %v822_v57, %v760_v25  ;;  %v690_v29 = vadd.f32 %v689_v10, %v2100_v47  ;;  %v765_v57 = vmul.f32 %v2131_v3, %v2131_v3 }
 0x160   :  { %v691_v5 = vadd.f32 %v2088_v41, %v690_v29  ;;  %v824_v31 = vadd.f32 %v823_v7, %v761_v48  ;;  %v766_v48 = vmul.f32 %v2116_v58, %v2116_v58 }
 0x162   :  { %v825_v39 = vadd.f32 %v824_v31, %v762_v13  ;;  %v692_v33 = vadd.f32 %v2096_v45, %v691_v5  ;;  %v767_v13 = vmul.f32 %v2127_v1, %v2127_v1 }
 0x164   :  { %v693_v18 = vadd.f32 %v692_v33, %v2120_v60  ;;  %v826_v27 = vadd.f32 %v825_v39, %v763_v53  ;;  %v768_v53 = vmul.f32 %v2148_v16, %v2148_v16 }
 0x166   :  { %v827_v25 = vadd.f32 %v826_v27, %v764_v4  ;;  %v694_v10 = vadd.f32 %v693_v18, %v2131_v3  ;;  %v769_v27 = vmul.f32 %v2159_v23, %v2159_v23 }
 0x168   :  { %v695_v7 = vadd.f32 %v2116_v58, %v694_v10  ;;  %v828_v29 = vadd.f32 %v827_v25, %v765_v57  ;;  %v770_v25 = vmul.f32 %v2144_v14, %v2144_v14 }
 0x16a   :  { %v829_v5 = vadd.f32 %v828_v29, %v766_v48  ;;  %v696_v31 = vadd.f32 %v2127_v1, %v695_v7  ;;  %v771_v48 = vmul.f32 %v2155_v21, %v2155_v21 }
 0x16c   :  { %v697_v39 = vadd.f32 %v696_v31, %v2148_v16  ;;  %v830_v33 = vadd.f32 %v829_v5, %v767_v13  ;;  %v772_v13 = vmul.f32 %v2176_v36, %v2176_v36 }
 0x16e   :  { %v831_v4 = vadd.f32 %v830_v33, %v768_v53  ;;  %v698_v18 = vadd.f32 %v697_v39, %v2159_v23  ;;  %v773_v33 = vmul.f32 %v2187_v51, %v2187_v51 }
 0x170   :  { %v699_v10 = vadd.f32 %v2144_v14, %v698_v18  ;;  %v832_v57 = vadd.f32 %v831_v4, %v769_v27  ;;  %v774_v4 = vmul.f32 %v2172_v34, %v2172_v34 }
 0x172   :  { %v833_v7 = vadd.f32 %v832_v57, %v770_v25  ;;  %v700_v29 = vadd.f32 %v2155_v21, %v699_v10  ;;  %v775_v25 = vmul.f32 %v2183_v49, %v2183_v49 }
 0x174   :  { %v701_v5 = vadd.f32 %v700_v29, %v2176_v36  ;;  %v834_v31 = vadd.f32 %v833_v7, %v771_v48  ;;  %v776_v48 = vmul.f32 %v2204_v8, %v2204_v8 }
 0x176   :  { %v835_v53 = vadd.f32 %v834_v31, %v772_v13  ;;  %v702_v39 = vadd.f32 %v701_v5, %v2187_v51  ;;  %v777_v31 = vmul.f32 %v2215_v19, %v2215_v19 }
 0x178   :  { %v703_v18 = vadd.f32 %v2172_v34, %v702_v39  ;;  %v836_v27 = vadd.f32 %v835_v53, %v773_v33  ;;  %v778_v53 = vmul.f32 %v2200_v6, %v2200_v6 }
 0x17a   :  { %v837_v10 = vadd.f32 %v836_v27, %v774_v4  ;;  %v704_v57 = vadd.f32 %v2183_v49, %v703_v18  ;;  %v779_v4 = vmul.f32 %v2211_v17, %v2211_v17 }
 0x17c   :  { %v705_v7 = vadd.f32 %v704_v57, %v2204_v8  ;;  %v838_v29 = vadd.f32 %v837_v10, %v775_v25  ;;  %v780_v25 = vmul.f32 %v2232_v52, %v2232_v52 }
 0x17e   :  { %v839_v13 = vadd.f32 %v838_v29, %v776_v48  ;;  %v706_v5 = vadd.f32 %v705_v7, %v2215_v19  ;;  %v781_v29 = vmul.f32 %v2243_v63, %v2243_v63 }
 0x180   :  { %v707_v39 = vadd.f32 %v2200_v6, %v706_v5  ;;  %v840_v33 = vadd.f32 %v839_v13, %v777_v31  ;;  %v782_v13 = vmul.f32 %v2228_v38, %v2228_v38 }
 0x182   :  { %v841_v18 = vadd.f32 %v840_v33, %v778_v53  ;;  %v708_v27 = vadd.f32 %v2211_v17, %v707_v39  ;;  %v783_v53 = vmul.f32 %v2239_v61, %v2239_v61 }
 0x184   :  { %v709_v10 = vadd.f32 %v708_v27, %v2232_v52  ;;  %v842_v57 = vadd.f32 %v841_v18, %v779_v4  ;;  %v784_v4 = vmul.f32 %v2260_v37, %v2260_v37 }
 0x186   :  { %v843_v48 = vadd.f32 %v842_v57, %v780_v25  ;;  %v710_v7 = vadd.f32 %v709_v10, %v2243_v63  ;;  %v785_v57 = vmul.f32 %v2271_v11, %v2271_v11 }
 0x188   :  { %v711_v5 = vadd.f32 %v2228_v38, %v710_v7  ;;  %v844_v31 = vadd.f32 %v843_v48, %v781_v29  ;;  %v786_v48 = vmul.f32 %v2256_v30, %v2256_v30 }
 0x18a   :  { %v845_v39 = vadd.f32 %v844_v31, %v782_v13  ;;  %v712_v33 = vadd.f32 %v2239_v61, %v711_v5  ;;  %v787_v13 = vmul.f32 %v2267_v9, %v2267_v9 }
 0x18c   :  { %v713_v18 = vadd.f32 %v712_v33, %v2260_v37  ;;  %v846_v27 = vadd.f32 %v845_v39, %v783_v53  ;;  %v788_v53 = vmul.f32 %v2288_v55, %v2288_v55 }
 0x18e   :  { %v847_v25 = vadd.f32 %v846_v27, %v784_v4  ;;  %v714_v10 = vadd.f32 %v713_v18, %v2271_v11  ;;  %v789_v27 = vmul.f32 %v2299_v26, %v2299_v26 }
 0x190   :  { %v715_v7 = vadd.f32 %v2256_v30, %v714_v10  ;;  %v848_v29 = vadd.f32 %v847_v25, %v785_v57  ;;  %v790_v25 = vmul.f32 %v2284_v54, %v2284_v54 }
 0x192   :  { %v849_v5 = vadd.f32 %v848_v29, %v786_v48  ;;  %v716_v31 = vadd.f32 %v2267_v9, %v715_v7  ;;  %v791_v48 = vmul.f32 %v2295_v28, %v2295_v28 }
 0x194   :  { %v717_v39 = vadd.f32 %v716_v31, %v2288_v55  ;;  %v850_v33 = vadd.f32 %v849_v5, %v787_v13 }
 0x196   :  { %v851_v4 = vadd.f32 %v850_v33, %v788_v53  ;;  %v718_v18 = vadd.f32 %v717_v39, %v2299_v26 }
 0x198   :  { %v719_v10 = vadd.f32 %v2284_v54, %v718_v18  ;;  %v852_v57 = vadd.f32 %v851_v4, %v789_v27 }
 0x19a   :  { %v720_v7 = vadd.f32 %v2295_v28, %v719_v10  ;;  %v853_v29 = vadd.f32 %v852_v57, %v790_v25  ;;  %v871_v25 = vlaneseq }
 0x19c   :  { %v721_v31 = vrot.slane %v720_v7, 4  ;;  %v854_v13 = vadd.f32 %v853_v29, %v791_v48  ;;  %v872_v57 = vshrl.u32 %v871_v25, 7  ;;  %v656_v48 = vld [vmem:[%s2904_s2] sm:$0x1]  ;;  %s2030_s2 = smov [#allocation7]  }
 0x19e   :  { %v722_v5 = vadd.f32 %v721_v31, %v720_v7  ;;  %v855_v53 = vrot.slane %v854_v13, 4  ;;  %v873_v7 = vsub.s32 0, %v872_v57  ;;  %v2960_v57 = vld [vmem:[#allocation18_spill] sm:$0xff] }
 0x1a0   :  { %v723_v39 = vrot.slane %v722_v5, 2  ;;  %v856_v33 = vadd.f32 %v855_v53, %v854_v13  ;;  %v2955_v53 = vld [vmem:[#allocation11_spill] sm:$0xff] }
 0x1a2   :  { %v724_v9 = vadd.f32 %v723_v39, %v722_v5  ;;  %v857_v30 = vrot.slane %v856_v33, 2  ;;  %v2956_v39 = vld [vmem:[#allocation13_spill] sm:$0xff] }
 0x1a4   :  { %v725_v11 = vrot.slane %v724_v9, 1  ;;  %v858_v37 = vadd.f32 %v857_v30, %v856_v33 }
 0x1a6   :  { %v726_v61 = vadd.f32 %v725_v11, %v724_v9  ;;  %v859_v38 = vrot.slane %v858_v37, 1 }
 0x1a8   :  { %v727_v18 = vmul.f32 0.001953125, %v726_v61  ;;  %v860_v4 = vadd.f32 %v859_v38, %v858_v37  ;;  %v657_v61 = vld [vmem:[%s2905_s3] sm:$0x1]  ;;  %s1399_s3 = sshll.u32 %s2030_s2, 4  ;;  %s1400_s3 = int_to_ptr.vmem [resolvable:$true] %s1399_s3 }
 0x1a9   :  { %s1998_s17 = scalar_lea.vmem %s1400_s3, 4096  ;;  %p2003_p3 = scmp.lt.s32.totalorder %s1400_s3, %s1400_s3 }
 0x1aa   :  { %v861_v27 = vmul.f32 0.001953125, %v860_v4  ;;  %v862_v54 = vmul.f32 %v727_v18, %v727_v18  ;;  %p1999_p2 = scmp.ne.s32.totalorder %s1400_s3, %s1998_s17  ;;  %p2004_p4 = scmp.lt.s32.totalorder %s1998_s17, %s1998_s17 }
 0x1ac   :  { %v863_v63 = vsub.f32 %v861_v27, %v862_v54  ;;  %p2005_p5 = por %p2004_p4, %p2003_p3 }
 0x1ae   :  { %v864_v52 = vmax.f32 %v863_v63, 0.0  ;;  %p2006_p6 = pnand %p2005_p5, %p1999_p2 }
 0x1b0   :  { %v865_v10 = vadd.f32 1e-05, %v864_v52 }
 0x1b2   :  { %1952 = vrsqrt.f32 %v865_v10 }
 0x1bc   :  { %v1953_v29 = vpop.eup %1952 }
 0x1bd   :  { %v867_v31 = vmul.f32 %v1953_v29, %v656_v48 }
 0x1bf   :  { %v868_v38 = vmul.f32 %v867_v31, %v727_v18  ;;  %v2412_v30 = vrot.slane %v867_v31, %v873_v7  ;;  %v2957_v18 = vld [vmem:[#allocation15_spill] sm:$0xff]  ;;  %v2962_v31 = vld [vmem:[#allocation16_spill] sm:$0xff] }
 0x1c1   :  { %v869_v37 = vsub.f32 %v657_v61, %v868_v38  ;;  %v936_v52 = vmul.f32 %v2412_v30, %v2288_v55  ;;  %v937_v63 = vmul.f32 %v2412_v30, %v2299_v26  ;;  %v2420_v9 = vmul.f32 %v2412_v30, %v2090_v42  ;;  %v2963_v38 = vld [vmem:[#allocation20_spill] sm:$0xff] }
 0x1c2   :  { %v2424_v11 = vmul.f32 %v2412_v30, %v2098_v46  ;;  %v2428_v54 = vmul.f32 %v2086_v40, %v2412_v30  ;;  %v2432_v13 = vmul.f32 %v2094_v44, %v2412_v30  ;;  %v2436_v55 = vmul.f32 %v2412_v30, %v2118_v59 }
 0x1c3   :  { %v2438_v26 = vrot.slane %v869_v37, %v873_v7  ;;  %v2442_v42 = vmul.f32 %v2412_v30, %v2129_v2  ;;  %v2446_v46 = vmul.f32 %v2113_v56, %v2412_v30  ;;  %v2450_v40 = vmul.f32 %v2125_v0, %v2412_v30  ;;  %v2961_v7 = vld [vmem:[#allocation22_spill] sm:$0xff] }
 0x1c4   :  { %v2454_v44 = vmul.f32 %v2412_v30, %v2146_v15  ;;  %v2458_v59 = vmul.f32 %v2412_v30, %v2157_v22  ;;  %v2462_v2 = vmul.f32 %v2141_v12, %v2412_v30  ;;  %v2466_v56 = vmul.f32 %v2153_v20, %v2412_v30 }
 0x1c5   :  { %v1006_v5 = vadd.f32 %v2438_v26, %v936_v52  ;;  %v1007_v0 = vadd.f32 %v2438_v26, %v937_v63  ;;  %v2472_v15 = vmul.f32 %v2412_v30, %v2174_v35  ;;  %v2476_v22 = vmul.f32 %v2412_v30, %v2185_v50  ;;  %v2958_v50 = vld [vmem:[#allocation12_spill] sm:$0xff]  ;;  %v2964_v63 = vld [vmem:[#allocation26_spill] sm:$0xff] }
 0x1c6   :  { %v2480_v12 = vmul.f32 %v2169_v32, %v2412_v30  ;;  %v2484_v20 = vmul.f32 %v2955_v53, %v2412_v30  ;;  %v2488_v33 = vmul.f32 %v2412_v30, %v2956_v39  ;;  %v2492_v35 = vmul.f32 %v2412_v30, %v2957_v18  ;;  %v2959_v32 = vld [vmem:[#allocation14_spill] sm:$0xff]  ;;  %v2968_v39 = vld [vmem:[#allocation24_spill] sm:$0xff] }
 0x1c7   :  { %v1070_v4 = vmax.f32 %v1006_v5, 0.0  ;;  %v1071_v27 = vmax.f32 %v1007_v0, 0.0  ;;  %v2496_v10 = vmul.f32 %v2958_v50, %v2412_v30  ;;  %v2500_v25 = vmul.f32 %v2959_v32, %v2412_v30  ;;  %v2966_v0 = vld [vmem:[#allocation30_spill] sm:$0xff]  ;;  %v2970_v50 = vld [vmem:[#allocation28_spill] sm:$0xff] }
 0x1c8   :  { %v2504_v48 = vmul.f32 %v2412_v30, %v2960_v57  ;;  %v2508_v29 = vmul.f32 %v2412_v30, %v2961_v7  ;;  %v2512_v61 = vmul.f32 %v2962_v31, %v2412_v30  ;;  %v2516_v37 = vmul.f32 %v2963_v38, %v2412_v30  ;;  %v2972_v57 = vld [vmem:[#allocation33_spill] sm:$0xff] }
 0x1c9   :  { %v1733_v52 = vpack.c.bf16 %v1071_v27, %v1070_v4  ;;  %v2520_v5 = vmul.f32 %v2412_v30, %v2964_v63  ;;  %v2524_v53 = vmul.f32 %v2412_v30, %v2966_v0  ;;  %v2528_v18 = vmul.f32 %v2968_v39, %v2412_v30  ;;  %v2974_v4 = vld [vmem:[#allocation34_spill] sm:$0xff] }
 0x1ca   :  { %v2532_v32 = vmul.f32 %v2970_v50, %v2412_v30  ;;  %v2536_v7 = vmul.f32 %v2412_v30, %v2972_v57  ;;  %v2540_v27 = vmul.f32 %v2412_v30, %v2974_v4  ;;  %v2544_v31 = vmul.f32 %v2281_v62, %v2412_v30  ;;  %v2977_v57 = vld [vmem:[#allocation19_spill] sm:$0xff] }
 0x1cb   :  { %2965 = vst [vmem:[#allocation11_spill] sm:$0xff] %v2520_v5  ;;  %2967 = vst [vmem:[#allocation13_spill] sm:$0xff] %v2524_v53  ;;  %v907_v38 = vmul.f32 %v2293_v24, %v2412_v30  ;;  %v908_v63 = vmul.f32 %v2412_v30, %v2092_v43  ;;  %v909_v0 = vmul.f32 %v2412_v30, %v2100_v47  ;;  %v2978_v4 = vld [vmem:[#allocation23_spill] sm:$0xff] }
 0x1cc   :  { %2969 = vst [vmem:[#allocation15_spill] sm:$0xff] %v2528_v18  ;;  %2971 = vst [vmem:[#allocation12_spill] sm:$0xff] %v2532_v32  ;;  %v910_v39 = vmul.f32 %v2088_v41, %v2412_v30  ;;  %v911_v50 = vmul.f32 %v2096_v45, %v2412_v30  ;;  %v912_v62 = vmul.f32 %v2412_v30, %v2120_v60  ;;  %v2982_v32 = vld [vmem:[#allocation31_spill] sm:$0xff] }
 0x1cd   :  { %2973 = vst [vmem:[#allocation14_spill] sm:$0xff] %v2536_v7  ;;  %2975 = vst [vmem:[#allocation18_spill] sm:$0xff] %v2540_v27  ;;  %v914_v24 = vmul.f32 %v2116_v58, %v2412_v30  ;;  %v915_v43 = vmul.f32 %v2127_v1, %v2412_v30  ;;  %v916_v47 = vmul.f32 %v2412_v30, %v2148_v16  ;;  %v2981_v7 = vld [vmem:[#allocation27_spill] sm:$0xff] }
 0x1ce   :  { %2976 = vst [vmem:[#allocation22_spill] sm:$0xff] %v2544_v31  ;;  %1769 = vst [vmem:[#allocation7 + $0xf0] sm:$0xff] %v1733_v52   ;;  %v913_v52 = vmul.f32 %v2412_v30, %v2131_v3  ;;  %v917_v41 = vmul.f32 %v2412_v30, %v2159_v23  ;;  %v918_v45 = vmul.f32 %v2144_v14, %v2412_v30 }
 0x1cf   :  { %v919_v60 = vmul.f32 %v2155_v21, %v2412_v30  ;;  %v920_v3 = vmul.f32 %v2412_v30, %v2176_v36  ;;  %v921_v58 = vmul.f32 %v2412_v30, %v2187_v51  ;;  %v922_v1 = vmul.f32 %v2172_v34, %v2412_v30 }
 0x1d0   :  { %v923_v16 = vmul.f32 %v2183_v49, %v2412_v30  ;;  %v924_v23 = vmul.f32 %v2412_v30, %v2204_v8  ;;  %v925_v14 = vmul.f32 %v2412_v30, %v2215_v19  ;;  %v926_v21 = vmul.f32 %v2200_v6, %v2412_v30  ;;  %v2979_v49 = vld [vmem:[#allocation17_spill] sm:$0xff] }
 0x1d1   :  { %v927_v36 = vmul.f32 %v2211_v17, %v2412_v30  ;;  %v928_v51 = vmul.f32 %v2412_v30, %v2977_v57  ;;  %v929_v34 = vmul.f32 %v2412_v30, %v2978_v4  ;;  %v930_v31 = vmul.f32 %v2979_v49, %v2412_v30  ;;  %v2980_v8 = vld [vmem:[#allocation21_spill] sm:$0xff]  ;;  %v2985_v4 = vld [vmem:[#allocation32_spill] sm:$0xff] }
 0x1d2   :  { %v931_v27 = vmul.f32 %v2980_v8, %v2412_v30  ;;  %v932_v19 = vmul.f32 %v2412_v30, %v2981_v7  ;;  %v933_v6 = vmul.f32 %v2412_v30, %v2982_v32  ;;  %v2983_v17 = vld [vmem:[#allocation25_spill] sm:$0xff]  ;;  %v938_v5 = vmul.f32 %v2985_v4, %v2412_v30 }
 0x1d3   :  { %v934_v18 = vmul.f32 %v2983_v17, %v2412_v30  ;;  %v2984_v57 = vld [vmem:[#allocation29_spill] sm:$0xff]  ;;  %v939_v49 = vmul.f32 %v2295_v28, %v2412_v30  ;;  %v2610_v8 = vadd.f32 %v2438_v26, %v2420_v9  ;;  %v2614_v7 = vadd.f32 %v2438_v26, %v2424_v11  ;;  %v2993_v4 = vld [vmem:[#allocation15_spill] sm:$0xff] }
 0x1d4   :  { %v935_v53 = vmul.f32 %v2984_v57, %v2412_v30  ;;  %v2618_v32 = vadd.f32 %v2438_v26, %v2428_v54  ;;  %v2622_v17 = vadd.f32 %v2438_v26, %v2432_v13  ;;  %v2626_v57 = vadd.f32 %v2438_v26, %v2436_v55 }
 0x1d5   :  { %v2630_v28 = vadd.f32 %v2438_v26, %v2442_v42  ;;  %v2634_v30 = vadd.f32 %v2438_v26, %v2446_v46  ;;  %v2638_v9 = vadd.f32 %v2438_v26, %v2450_v40  ;;  %v2642_v11 = vadd.f32 %v2438_v26, %v2454_v44 }
 0x1d6   :  { %v2646_v54 = vadd.f32 %v2438_v26, %v2458_v59  ;;  %v2650_v13 = vadd.f32 %v2438_v26, %v2462_v2  ;;  %v2654_v55 = vadd.f32 %v2438_v26, %v2466_v56  ;;  %v2658_v42 = vadd.f32 %v2438_v26, %v2472_v15 }
 0x1d7   :  { %v2662_v46 = vadd.f32 %v2438_v26, %v2476_v22  ;;  %v2666_v40 = vadd.f32 %v2438_v26, %v2480_v12  ;;  %v2670_v44 = vadd.f32 %v2438_v26, %v2484_v20  ;;  %v2674_v59 = vadd.f32 %v2438_v26, %v2488_v33 }
 0x1d8   :  { %v2678_v2 = vadd.f32 %v2438_v26, %v2492_v35  ;;  %v2682_v56 = vadd.f32 %v2438_v26, %v2496_v10  ;;  %v2686_v15 = vadd.f32 %v2438_v26, %v2500_v25  ;;  %v2690_v22 = vadd.f32 %v2438_v26, %v2504_v48  ;;  %v2989_v35 = vld [vmem:[#allocation11_spill] sm:$0xff]  ;;  %v2991_v25 = vld [vmem:[#allocation13_spill] sm:$0xff] }
 0x1d9   :  { %v2694_v12 = vadd.f32 %v2438_v26, %v2508_v29  ;;  %v2698_v20 = vadd.f32 %v2438_v26, %v2512_v61  ;;  %v2702_v33 = vadd.f32 %v2438_v26, %v2516_v37  ;;  %v2706_v10 = vadd.f32 %v2438_v26, %v2989_v35 }
 0x1da   :  { %v2710_v48 = vadd.f32 %v2438_v26, %v2991_v25  ;;  %v2714_v29 = vadd.f32 %v2438_v26, %v2993_v4  ;;  %v2736_v4 = vadd.f32 %v2438_v26, %v908_v63  ;;  %v2757_v63 = vadd.f32 %v2438_v26, %v915_v43 }
 0x1db   :  { %2986 = vst [vmem:[#allocation16_spill] sm:$0xff] %v2694_v12  ;;  %2987 = vst [vmem:[#allocation20_spill] sm:$0xff] %v2698_v20  ;;  %v2994_v12 = vld [vmem:[#allocation12_spill] sm:$0xff]  ;;  %v2995_v20 = vld [vmem:[#allocation14_spill] sm:$0xff]  ;;  %v2778_v43 = vadd.f32 %v2438_v26, %v922_v1  ;;  %v2799_v1 = vadd.f32 %v2438_v26, %v929_v34  ;;  %v2820_v34 = vadd.f32 %v2438_v26, %v938_v5  ;;  %v1017_v5 = vmax.f32 %v2638_v9, 0.0 }
 0x1dc   :  { %2988 = vst [vmem:[#allocation26_spill] sm:$0xff] %v2702_v33  ;;  %2990 = vst [vmem:[#allocation30_spill] sm:$0xff] %v2706_v10  ;;  %v2718_v61 = vadd.f32 %v2438_v26, %v2994_v12  ;;  %v2722_v37 = vadd.f32 %v2438_v26, %v2995_v20  ;;  %v2997_v33 = vld [vmem:[#allocation18_spill] sm:$0xff]  ;;  %v2739_v12 = vadd.f32 %v2438_v26, %v909_v0  ;;  %v1028_v9 = vmax.f32 %v2682_v56, 0.0 }
 0x1dd   :  { %2992 = vst [vmem:[#allocation24_spill] sm:$0xff] %v2710_v48  ;;  %v2726_v35 = vadd.f32 %v2438_v26, %v2997_v33  ;;  %v2998_v10 = vld [vmem:[#allocation22_spill] sm:$0xff]  ;;  %v2733_v48 = vadd.f32 %v2438_v26, %v907_v38  ;;  %v2742_v20 = vadd.f32 %v2438_v26, %v910_v39  ;;  %v2748_v33 = vadd.f32 %v2438_v26, %v912_v62 }
 0x1de   :  { %2996 = vst [vmem:[#allocation28_spill] sm:$0xff] %v2722_v37  ;;  %v2730_v25 = vadd.f32 %v2438_v26, %v2998_v10  ;;  %v2745_v37 = vadd.f32 %v2438_v26, %v911_v50  ;;  %v2751_v10 = vadd.f32 %v2438_v26, %v913_v52  ;;  %v2754_v38 = vadd.f32 %v2438_v26, %v914_v24 }
 0x1df   :  { %v2760_v0 = vadd.f32 %v2438_v26, %v916_v47  ;;  %v2763_v39 = vadd.f32 %v2438_v26, %v917_v41  ;;  %v2766_v50 = vadd.f32 %v2438_v26, %v918_v45  ;;  %v2769_v62 = vadd.f32 %v2438_v26, %v919_v60  ;;  %3005 = vst [vmem:[#allocation27_spill] sm:$0xff] %v2820_v34 }
 0x1e0   :  { %v2772_v52 = vadd.f32 %v2438_v26, %v920_v3  ;;  %v2775_v24 = vadd.f32 %v2438_v26, %v921_v58  ;;  %v2781_v47 = vadd.f32 %v2438_v26, %v923_v16  ;;  %v2784_v41 = vadd.f32 %v2438_v26, %v924_v23 }
 0x1e1   :  { %v2787_v45 = vadd.f32 %v2438_v26, %v925_v14  ;;  %v2790_v60 = vadd.f32 %v2438_v26, %v926_v21  ;;  %v2793_v3 = vadd.f32 %v2438_v26, %v927_v36  ;;  %v2796_v58 = vadd.f32 %v2438_v26, %v928_v51 }
 0x1e2   :  { %v2802_v16 = vadd.f32 %v2438_v26, %v930_v31  ;;  %v2805_v23 = vadd.f32 %v2438_v26, %v931_v27  ;;  %v2808_v14 = vadd.f32 %v2438_v26, %v932_v19  ;;  %v2811_v21 = vadd.f32 %v2438_v26, %v933_v6 }
 0x1e3   :  { %v2814_v36 = vadd.f32 %v2438_v26, %v934_v18  ;;  %v2817_v51 = vadd.f32 %v2438_v26, %v935_v53  ;;  %v2823_v31 = vadd.f32 %v2438_v26, %v939_v49  ;;  %v1010_v27 = vmax.f32 %v2610_v8, 0.0 }
 0x1e4   :  { %2999 = vst [vmem:[#allocation33_spill] sm:$0xff] %v2802_v16  ;;  %3000 = vst [vmem:[#allocation34_spill] sm:$0xff] %v2805_v23  ;;  %v1011_v19 = vmax.f32 %v2614_v7, 0.0  ;;  %v1013_v6 = vmax.f32 %v2622_v17, 0.0  ;;  %v1014_v18 = vmax.f32 %v2626_v57, 0.0  ;;  %v1016_v53 = vmax.f32 %v2634_v30, 0.0 }
 0x1e5   :  { %3001 = vst [vmem:[#allocation19_spill] sm:$0xff] %v2808_v14  ;;  %3002 = vst [vmem:[#allocation23_spill] sm:$0xff] %v2811_v21  ;;  %v1012_v14 = vmax.f32 %v2618_v32, 0.0  ;;  %v1018_v34 = vmax.f32 %v2642_v11, 0.0  ;;  %v1019_v26 = vmax.f32 %v2646_v54, 0.0  ;;  %v1020_v49 = vmax.f32 %v2650_v13, 0.0 }
 0x1e6   :  { %3003 = vst [vmem:[#allocation17_spill] sm:$0xff] %v2814_v36  ;;  %3004 = vst [vmem:[#allocation21_spill] sm:$0xff] %v2817_v51  ;;  %v1015_v36 = vmax.f32 %v2630_v28, 0.0  ;;  %v1021_v8 = vmax.f32 %v2654_v55, 0.0  ;;  %v1022_v7 = vmax.f32 %v2658_v42, 0.0  ;;  %v1023_v32 = vmax.f32 %v2662_v46, 0.0 }
 0x1e7   :  { %3006 = vst [vmem:[#allocation31_spill] sm:$0xff] %v2823_v31  ;;  %v1024_v17 = vmax.f32 %v2666_v40, 0.0  ;;  %v1025_v57 = vmax.f32 %v2670_v44, 0.0  ;;  %v1026_v28 = vmax.f32 %v2674_v59, 0.0  ;;  %v1027_v30 = vmax.f32 %v2678_v2, 0.0  ;;  %v3007_v13 = vld [vmem:[#allocation16_spill] sm:$0xff] }
 0x1e8   :  { %v1029_v11 = vmax.f32 %v2686_v15, 0.0  ;;  %v1030_v54 = vmax.f32 %v2690_v22, 0.0  ;;  %v1031_v55 = vmax.f32 %v3007_v13, 0.0  ;;  %v3008_v31 = vld [vmem:[#allocation20_spill] sm:$0xff]  ;;  %v3009_v51 = vld [vmem:[#allocation26_spill] sm:$0xff]  ;;  %v1036_v59 = vmax.f32 %v2714_v29, 0.0 }
 0x1e9   :  { %v1032_v42 = vmax.f32 %v3008_v31, 0.0  ;;  %v1033_v46 = vmax.f32 %v3009_v51, 0.0  ;;  %v3010_v21 = vld [vmem:[#allocation30_spill] sm:$0xff]  ;;  %v3011_v23 = vld [vmem:[#allocation24_spill] sm:$0xff]  ;;  %v1037_v2 = vmax.f32 %v2718_v61, 0.0  ;;  %v1039_v15 = vmax.f32 %v2726_v35, 0.0 }
 0x1ea   :  { %v1034_v40 = vmax.f32 %v3010_v21, 0.0  ;;  %v1035_v44 = vmax.f32 %v3011_v23, 0.0  ;;  %v3012_v16 = vld [vmem:[#allocation28_spill] sm:$0xff]  ;;  %v1040_v22 = vmax.f32 %v2730_v25, 0.0  ;;  %v1041_v13 = vmax.f32 %v2733_v48, 0.0 }
 0x1eb   :  { %v1038_v56 = vmax.f32 %v3012_v16, 0.0  ;;  %v1042_v31 = vmax.f32 %v2736_v4, 0.0  ;;  %v1043_v51 = vmax.f32 %v2739_v12, 0.0  ;;  %v1044_v21 = vmax.f32 %v2742_v20, 0.0 }
 0x1ec   :  { %v1045_v23 = vmax.f32 %v2745_v37, 0.0  ;;  %v1046_v29 = vmax.f32 %v2748_v33, 0.0  ;;  %v1047_v61 = vmax.f32 %v2751_v10, 0.0  ;;  %v1048_v16 = vmax.f32 %v2754_v38, 0.0 }
 0x1ed   :  { %v1049_v35 = vmax.f32 %v2757_v63, 0.0  ;;  %v1050_v25 = vmax.f32 %v2760_v0, 0.0  ;;  %v1051_v48 = vmax.f32 %v2763_v39, 0.0  ;;  %v1052_v4 = vmax.f32 %v2766_v50, 0.0 }
 0x1ee   :  { %v1053_v12 = vmax.f32 %v2769_v62, 0.0  ;;  %v1054_v20 = vmax.f32 %v2772_v52, 0.0  ;;  %v1055_v37 = vmax.f32 %v2775_v24, 0.0  ;;  %v1056_v33 = vmax.f32 %v2778_v43, 0.0  ;;  %v3013_v52 = vld [vmem:[#allocation33_spill] sm:$0xff]  ;;  %v3014_v43 = vld [vmem:[#allocation34_spill] sm:$0xff] }
 0x1ef   :  { %v1057_v10 = vmax.f32 %v2781_v47, 0.0  ;;  %v1058_v38 = vmax.f32 %v2784_v41, 0.0  ;;  %v1059_v63 = vmax.f32 %v2787_v45, 0.0  ;;  %v1060_v0 = vmax.f32 %v2790_v60, 0.0  ;;  %v3015_v41 = vld [vmem:[#allocation19_spill] sm:$0xff] }
 0x1f0   :  { %v1061_v39 = vmax.f32 %v2793_v3, 0.0  ;;  %v1062_v50 = vmax.f32 %v2796_v58, 0.0  ;;  %v1063_v62 = vmax.f32 %v2799_v1, 0.0  ;;  %v1064_v24 = vmax.f32 %v3013_v52, 0.0  ;;  %v3016_v60 = vld [vmem:[#allocation23_spill] sm:$0xff]  ;;  %v3017_v58 = vld [vmem:[#allocation17_spill] sm:$0xff] }
 0x1f1   :  { %v1065_v47 = vmax.f32 %v3014_v43, 0.0  ;;  %v1066_v45 = vmax.f32 %v3015_v41, 0.0  ;;  %v1067_v3 = vmax.f32 %v3016_v60, 0.0  ;;  %v1068_v1 = vmax.f32 %v3017_v58, 0.0  ;;  %v3018_v52 = vld [vmem:[#allocation21_spill] sm:$0xff]  ;;  %v3019_v41 = vld [vmem:[#allocation27_spill] sm:$0xff] }
 0x1f2   :  { %v1069_v43 = vmax.f32 %v3018_v52, 0.0  ;;  %v1072_v60 = vmax.f32 %v3019_v41, 0.0  ;;  %v3020_v58 = vld [vmem:[#allocation31_spill] sm:$0xff]  ;;  %v1583_v41 = vpack.c.bf16 %v1011_v19, %v1010_v27  ;;  %v1593_v19 = vpack.c.bf16 %v1015_v36, %v1014_v18 }
 0x1f3   :  { %v1073_v52 = vmax.f32 %v3020_v58, 0.0  ;;  %v1588_v58 = vpack.c.bf16 %v1013_v6, %v1012_v14  ;;  %v1598_v27 = vpack.c.bf16 %v1017_v5, %v1016_v53  ;;  %v1603_v6 = vpack.c.bf16 %v1019_v26, %v1018_v34 }
 0x1f4   :  { %1584 = vst [vmem:[#allocation7] sm:$0xff] %v1583_v41   ;;  %v1608_v14 = vpack.c.bf16 %v1021_v8, %v1020_v49  ;;  %v1613_v18 = vpack.c.bf16 %v1023_v32, %v1022_v7  ;;  %v1618_v36 = vpack.c.bf16 %v1025_v57, %v1024_v17  ;;  %v1623_v5 = vpack.c.bf16 %v1027_v30, %v1026_v28 }
 0x1f5   :  { %1740 = vst [vmem:[#allocation7 + $0x8] sm:$0xff] %v1588_v58   ;;  %1741 = vst [vmem:[#allocation7 + $0x10] sm:$0xff] %v1593_v19   ;;  %v1628_v53 = vpack.c.bf16 %v1029_v11, %v1028_v9  ;;  %v1633_v26 = vpack.c.bf16 %v1031_v55, %v1030_v54  ;;  %v1638_v34 = vpack.c.bf16 %v1033_v46, %v1032_v42 }
 0x1f6   :  { %1742 = vst [vmem:[#allocation7 + $0x18] sm:$0xff] %v1598_v27   ;;  %1743 = vst [vmem:[#allocation7 + $0x20] sm:$0xff] %v1603_v6   ;;  %v1643_v41 = vpack.c.bf16 %v1035_v44, %v1034_v40  ;;  %v1648_v8 = vpack.c.bf16 %v1037_v2, %v1036_v59  ;;  %v1653_v49 = vpack.c.bf16 %v1039_v15, %v1038_v56 }
 0x1f7   :  { %1744 = vst [vmem:[#allocation7 + $0x28] sm:$0xff] %v1608_v14   ;;  %1745 = vst [vmem:[#allocation7 + $0x30] sm:$0xff] %v1613_v18   ;;  %v1658_v7 = vpack.c.bf16 %v1041_v13, %v1040_v22  ;;  %v1663_v32 = vpack.c.bf16 %v1043_v51, %v1042_v31  ;;  %v1668_v17 = vpack.c.bf16 %v1045_v23, %v1044_v21 }
 0x1f8   :  { %1746 = vst [vmem:[#allocation7 + $0x38] sm:$0xff] %v1618_v36   ;;  %1747 = vst [vmem:[#allocation7 + $0x40] sm:$0xff] %v1623_v5   ;;  %v1673_v57 = vpack.c.bf16 %v1047_v61, %v1046_v29  ;;  %v1678_v28 = vpack.c.bf16 %v1049_v35, %v1048_v16  ;;  %v1683_v30 = vpack.c.bf16 %v1051_v48, %v1050_v25 }
 0x1f9   :  { %1748 = vst [vmem:[#allocation7 + $0x48] sm:$0xff] %v1628_v53   ;;  %1749 = vst [vmem:[#allocation7 + $0x50] sm:$0xff] %v1633_v26   ;;  %v1688_v9 = vpack.c.bf16 %v1053_v12, %v1052_v4  ;;  %v1693_v11 = vpack.c.bf16 %v1055_v37, %v1054_v20  ;;  %v1698_v54 = vpack.c.bf16 %v1057_v10, %v1056_v33 }
 0x1fa   :  { %1750 = vst [vmem:[#allocation7 + $0x58] sm:$0xff] %v1638_v34   ;;  %1751 = vst [vmem:[#allocation7 + $0x60] sm:$0xff] %v1643_v41   ;;  %v1703_v55 = vpack.c.bf16 %v1059_v63, %v1058_v38  ;;  %v1708_v42 = vpack.c.bf16 %v1061_v39, %v1060_v0  ;;  %v1713_v46 = vpack.c.bf16 %v1063_v62, %v1062_v50 }
 0x1fb   :  { %1752 = vst [vmem:[#allocation7 + $0x68] sm:$0xff] %v1648_v8   ;;  %1753 = vst [vmem:[#allocation7 + $0x70] sm:$0xff] %v1653_v49   ;;  %v1718_v40 = vpack.c.bf16 %v1065_v47, %v1064_v24  ;;  %v1723_v44 = vpack.c.bf16 %v1067_v3, %v1066_v45  ;;  %v1728_v59 = vpack.c.bf16 %v1069_v43, %v1068_v1 }
 0x1fc   :  { %1754 = vst [vmem:[#allocation7 + $0x78] sm:$0xff] %v1658_v7   ;;  %1755 = vst [vmem:[#allocation7 + $0x80] sm:$0xff] %v1663_v32   ;;  %v1738_v2 = vpack.c.bf16 %v1073_v52, %v1072_v60 }
 0x1fd   :  { %1756 = vst [vmem:[#allocation7 + $0x88] sm:$0xff] %v1668_v17   ;;  %1757 = vst [vmem:[#allocation7 + $0x90] sm:$0xff] %v1673_v57  }
 0x1fe   :  { %1758 = vst [vmem:[#allocation7 + $0x98] sm:$0xff] %v1678_v28   ;;  %1759 = vst [vmem:[#allocation7 + $0xa0] sm:$0xff] %v1683_v30  }
 0x1ff   :  { %1760 = vst [vmem:[#allocation7 + $0xa8] sm:$0xff] %v1688_v9   ;;  %1761 = vst [vmem:[#allocation7 + $0xb0] sm:$0xff] %v1693_v11  }
 0x200   :  { %1762 = vst [vmem:[#allocation7 + $0xb8] sm:$0xff] %v1698_v54   ;;  %1763 = vst [vmem:[#allocation7 + $0xc0] sm:$0xff] %v1703_v55  }
 0x201   :  { %1764 = vst [vmem:[#allocation7 + $0xc8] sm:$0xff] %v1708_v42   ;;  %1765 = vst [vmem:[#allocation7 + $0xd0] sm:$0xff] %v1713_v46  }
 0x202   :  { %1766 = vst [vmem:[#allocation7 + $0xd8] sm:$0xff] %v1718_v40   ;;  %1767 = vst [vmem:[#allocation7 + $0xe0] sm:$0xff] %v1723_v44  }
 0x203   :  { %1768 = vst [vmem:[#allocation7 + $0xe8] sm:$0xff] %v1728_v59   ;;  %1770 = vst [vmem:[#allocation7 + $0xf8] sm:$0xff] %v1738_v2  }
 0x204   :  { %2009 = shalt.err (!%p2006_p6)
}
 0x205   :  { %s2010_s20 = scalar_lea.hbm %s2906_s4, 4096 }
 0x206   :  { %p2011_p7 = scmp.ne.s32.totalorder %s2906_s4, %s2010_s20  ;;  %p2014_p8 = scmp.lt.u32.totalorder %s2010_s20, %s2906_s4 }
 0x208   :  { %p2016_p9 = pnand %p2014_p8, %p2011_p7 }
 0x20a   :  { %2019 = shalt.err (!%p2016_p9)
}
 0x20b   :  { %1405 = dma.vmem_to_hbm [thread:$0]  %s1400_s3, 4096, %s2906_s4, [#allocation4], %s2027_s25, %s2027_s25, %s2028_s26  }
 0x20c   :  { %2024 = dma.done.wait [#allocation4], 4096  }
 0x20d   :  { %2025 = vsyncadd [#allocation4], 4294963200 }
 0x20e   :  { %1409 = vsyncpa [#allocation3], 1 }
 0x20f   :  { %1410 = vsyncpa [#allocation6], 1 }
 0x210   :  { %1411 = vsyncpa [#allocation4], 1 }

</bundles_post_ra>
